<compile_context>
chip_gen: v7x
topology: tpu7x:2x2x1
jax: 0.10.0
libtpu: 0.0.40
codegen_flags: <defaults>
</compile_context>

<pallas_src>
import math

import jax
import jax.numpy as jnp
import numpy as np
from jax import lax
from jax.experimental import pallas as pl
from jax.experimental.pallas import tpu as pltpu

VMEM = pltpu.MemorySpace.VMEM
SMEM = pltpu.MemorySpace.SMEM


def _round_up(x, m):
    return -(-x // m) * m


# --------------------------------- fused kernel -------------------------------------
def _make_fused_kernel(l2, coef, tbl_slices):
    """l2, coef = len(embs)/2 * gamma (Python true division, as in the reference), and
    the static (start, size) sublane stripes of each table are baked in as constants."""

    def kernel(ms_ref, samp_ref, inp_ref, wt_ref,
               metaT_ref, relT_ref, ecatT_ref, wcatT_ref,
               loss_ref, semb_ref, sgraph_ref):
        metaT = metaT_ref[...]                                   # (D, V) bf16
        relT = relT_ref[...]                                     # (D, R) bf16
        V = metaT.shape[1]
        R = relT.shape[1]

        # ----------------- graph (triplet-margin) part -----------------
        samp = samp_ref[...]                                     # (3, 2B) int32
        twoB = samp.shape[1]
        B = twoB // 2
        iota_v = lax.broadcasted_iota(jnp.int32, (V, twoB), 0)
        iota_r = lax.broadcasted_iota(jnp.int32, (R, twoB), 0)
        subs = samp[0:1, :]                                      # (1, 2B)
        rels = samp[1:2, :]
        objs = samp[2:3, :]
        # signed one-hot gather, pos+neg stacked -> ONE dot vs meta, ONE vs rel.
        # NOTE: out-of-range ids yield an all-zero one-hot column (zero embedding)
        # instead of erroring like torch.nn.Embedding.
        soh = ((subs == iota_v).astype(jnp.bfloat16)
               - (objs == iota_v).astype(jnp.bfloat16))          # (V, 2B)
        roh = (rels == iota_r).astype(jnp.bfloat16)              # (R, 2B)
        qT = (jnp.dot(metaT, soh, preferred_element_type=jnp.float32)
              + jnp.dot(relT, roh, preferred_element_type=jnp.float32))  # (D, 2B)
        sq = jnp.sum(qT * qT, axis=0, keepdims=True)             # (1, 2B) == -scores
        margin = jnp.maximum(1.0 + sq[:, :B] - sq[:, B:], 0.0)   # relu(1 - (p - n))
        ms = ms_ref[0, 0]
        sgraph = jnp.sum((ms + wt_ref[...]) * margin)

        # --------- embedding reconstruction, fused & transposed ---------
        # recon^T = W_cat^T @ meta^T - E_cat^T  (one V-sized matmul), then a single
        # N-sized matmul against the input one-hot.
        reconT = (jnp.dot(wcatT_ref[...], metaT,
                          preferred_element_type=jnp.float32)
                  - ecatT_ref[...].astype(jnp.float32))          # (P, V) f32
        N = inp_ref.shape[1]
        iota_vn = lax.broadcasted_iota(jnp.int32, (V, N), 0)
        inp_ohT = (inp_ref[...] == iota_vn).astype(jnp.bfloat16)  # (V, N)
        diffT = jnp.dot(reconT.astype(jnp.bfloat16), inp_ohT,
                        preferred_element_type=jnp.float32)       # (P, N) f32
        # Per-table L2 row norms: every table sits in its own 128-aligned, zero-padded
        # sublane stripe, so the reduction is a plain sublane sum — no selector matmul.
        norm_sum = jnp.float32(0.0)
        for start, size in tbl_slices:
            sl = diffT[start:start + size, :]
            norm_sum = norm_sum + jnp.sum(
                jnp.sqrt(jnp.sum(sl * sl, axis=0, keepdims=True)))
        # L1(W_cat) == sum of per-table L1 norms (padding rows are exactly zero).
        wnorm = jnp.sum(jnp.abs(wcatT_ref[...].astype(jnp.float32)))
        semb = norm_sum + l2 * wnorm

        loss = semb + coef * sgraph / (ms + ms)

        loss_ref[0, 0] = loss
        semb_ref[0, 0] = semb
        sgraph_ref[0, 0] = sgraph

    return kernel


# ------------------------ one-time (per model) constant prep -------------------------
def prepare_frozen(embs):
    """Build the transposed, per-table-128-padded frozen embedding slab ONCE.

    The frozen tables never change, so this stays out of the per-step path."""
    dims = [int(e.shape[1]) for e in embs]
    pads = [_round_up(d, 128) for d in dims]
    blocks = []
    for e, d, p in zip(embs, dims, pads):
        eT = jnp.transpose(e).astype(jnp.bfloat16)               # (d, V)
        blocks.append(jnp.pad(eT, ((0, p - d), (0, 0))))
    ecatT = jnp.concatenate(blocks, axis=0)                      # (P, V) bf16
    slices, off = [], 0
    for p in pads:
        slices.append((off, p))
        off += p
    return dict(ecatT=ecatT, dims=tuple(dims), pads=tuple(pads),
                P=int(off), tbl_slices=tuple(slices))


# -------------------------------- forward wrapper ------------------------------------
def ensemble_forward(params, frozen, inp, pos_samples, neg_samples, weight, meanscore):
    # Trainable params: transpose + cast to bf16 (tiny ops; a real training loop would
    # simply keep them stored transposed).
    metaT = jnp.transpose(params["metaemb"]).astype(jnp.bfloat16)   # (D, V)
    relT = jnp.transpose(params["relemb"]).astype(jnp.bfloat16)     # (D, R)
    dims, pads = frozen["dims"], frozen["pads"]
    w_blocks = []
    for w, d, p in zip(params["Ws"], dims, pads):
        wT = jnp.transpose(w).astype(jnp.bfloat16)                   # (d, D)
        w_blocks.append(jnp.pad(wT, ((0, p - d), (0, 0))))
    wcatT = jnp.concatenate(w_blocks, axis=0)                        # (P, D) bf16

    gamma = float(params["gamma"])
    l2 = float(params["l2"])
    T = len(dims)
    coef = T / 2 * gamma                                             # len(embs)/2 * gamma

    B = pos_samples.shape[0]
    N = inp.shape[0]

    # Transposed "batch on lanes" layouts (no lane-minor width-1/width-3 arrays).
    samp = jnp.transpose(
        jnp.concatenate([pos_samples, neg_samples], axis=0).astype(jnp.int32))  # (3, 2B)
    inp2 = inp.reshape(1, N).astype(jnp.int32)                                  # (1, N)
    wt2 = weight.reshape(1, B).astype(jnp.float32)                              # (1, B)
    ms = jnp.reshape(meanscore, (1, 1)).astype(jnp.float32)

    kernel = _make_fused_kernel(l2, coef, frozen["tbl_slices"])
    vspec = pl.BlockSpec(memory_space=VMEM)
    sspec = pl.BlockSpec(memory_space=SMEM)

    loss, semb, sgraph = pl.pallas_call(
        kernel,
        out_shape=(jax.ShapeDtypeStruct((1, 1), jnp.float32),
                   jax.ShapeDtypeStruct((1, 1), jnp.float32),
                   jax.ShapeDtypeStruct((1, 1), jnp.float32)),
        in_specs=[sspec, vspec, vspec, vspec, vspec, vspec, vspec, vspec],
        out_specs=(sspec, sspec, sspec),
    )(ms, samp, inp2, wt2, metaT, relT, frozen["ecatT"], wcatT)

    return loss[0, 0], semb[0, 0], sgraph[0, 0]


# --------------------------- pure-JAX reference (f32) --------------------------------
def reference_forward(params, inp, pos_samples, neg_samples, weight, meanscore):
    meta, rel = params["metaemb"], params["relemb"]
    gamma, l2 = params["gamma"], params["l2"]

    def scores(s):
        q = meta[s[:, 0]] + rel[s[:, 1]] - meta[s[:, 2]]
        return -jnp.sum(q * q, axis=1)

    p, n = scores(pos_samples), scores(neg_samples)
    sG = jnp.sum((meanscore + weight) * jnp.maximum(1.0 - (p - n), 0.0))
    inpemb = meta[inp]
    sE_vec = 0.0
    wnorm = 0.0
    for e, W in zip(params["embs"], params["Ws"]):
        d = inpemb @ W - e[inp]
        sE_vec = sE_vec + jnp.sqrt(jnp.sum(d * d, axis=1))
        wnorm = wnorm + jnp.sum(jnp.abs(W))
    sE = jnp.sum(sE_vec) + l2 * wnorm
    loss = sE + len(params["embs"]) / 2 * gamma * sG / (meanscore + meanscore)
    return loss, sE, sG


# ---------------------------------------- main ----------------------------------------
if __name__ == "__main__":
    key = jax.random.PRNGKey(0)
    vocab_size, rel_size = 16, 4
    embedding_dim = 32
    dims = (32, 64)
    N, B = 8, 8
    gamma, l2 = 1.0, 0.01

    k = jax.random.split(key, 10)
    # NOTE: the PyTorch module inits metaemb/relemb to zeros (uniform_(-0, 0)); we use
    # small deterministic random values so the forward pass has non-trivial numerics.
    metaemb = jax.random.normal(k[0], (vocab_size + 1, embedding_dim), jnp.float32) * 0.1
    metaemb = metaemb.at[0].set(0.0)                  # metaemb.weight.data[0] = 0
    relemb = jax.random.normal(k[1], (rel_size + 1, embedding_dim), jnp.float32) * 0.1
    embs = [jax.random.normal(k[2 + i], (vocab_size + 1, d), jnp.float32) * 0.1
            for i, d in enumerate(dims)]
    stdv = 1.0 / math.sqrt(embedding_dim)
    Ws = [jax.random.uniform(k[4 + i], (embedding_dim, d), jnp.float32, -stdv, stdv)
          for i, d in enumerate(dims)]

    inp = jax.random.randint(k[6], (N,), 0, vocab_size + 1)
    pos_samples = jnp.stack([
        jax.random.randint(jax.random.fold_in(k[7], 0), (B,), 0, vocab_size + 1),
        jax.random.randint(jax.random.fold_in(k[7], 1), (B,), 0, rel_size + 1),
        jax.random.randint(jax.random.fold_in(k[7], 2), (B,), 0, vocab_size + 1)], axis=1)
    neg_samples = jnp.stack([
        jax.random.randint(jax.random.fold_in(k[8], 0), (B,), 0, vocab_size + 1),
        jax.random.randint(jax.random.fold_in(k[8], 1), (B,), 0, rel_size + 1),
        jax.random.randint(jax.random.fold_in(k[8], 2), (B,), 0, vocab_size + 1)], axis=1)
    weight = jax.random.uniform(k[9], (B,), jnp.float32)
    meanscore = jnp.float32(0.5)

    params = dict(metaemb=metaemb, relemb=relemb, embs=embs, Ws=Ws, gamma=gamma, l2=l2)

    # data-independent constants built once (hoisted out of the per-step path)
    frozen = prepare_frozen(embs)

    loss, sEmb, sGraph = ensemble_forward(params, frozen, inp, pos_samples, neg_samples,
                                          weight, meanscore)
    jax.block_until_ready((loss, sEmb, sGraph))

    # loose check vs f32 reference (kernel uses bf16 matmul operands, f32 accumulation)
    rl, re, rg = reference_forward(params, inp, pos_samples, neg_samples, weight, meanscore)
    np.testing.assert_allclose(np.array([loss, sEmb, sGraph], dtype=np.float64),
                               np.array([rl, re, rg], dtype=np.float64),
                               rtol=1e-1, atol=5e-2)

    print("KERNEL_OK")
</pallas_src>

<mosaic_0001>
module attributes {stable_mosaic.version = 11 : i64} {
  func.func @kernel(%arg0: memref<1x1xf32, #tpu.memory_space<smem>>, %arg1: memref<3x16xi32, #tpu.memory_space<vmem>>, %arg2: memref<1x8xi32, #tpu.memory_space<vmem>>, %arg3: memref<1x8xf32, #tpu.memory_space<vmem>>, %arg4: memref<32x17xbf16, #tpu.memory_space<vmem>>, %arg5: memref<32x5xbf16, #tpu.memory_space<vmem>>, %arg6: memref<256x17xbf16, #tpu.memory_space<vmem>>, %arg7: memref<256x32xbf16, #tpu.memory_space<vmem>>, %arg8: memref<1x1xf32, #tpu.memory_space<smem>>, %arg9: memref<1x1xf32, #tpu.memory_space<smem>>, %arg10: memref<1x1xf32, #tpu.memory_space<smem>>) attributes {dimension_semantics = [], scalar_prefetch = 0 : i64, scratch_operands = 0 : i64, tpu.core_type = #tpu.core_type<tc>} {
    %c0 = arith.constant 0 : index
    %c0_0 = arith.constant 0 : index
    %0 = vector.load %arg4[%c0, %c0_0] : memref<32x17xbf16, #tpu.memory_space<vmem>>, vector<32x17xbf16>
    %c0_1 = arith.constant 0 : index
    %c0_2 = arith.constant 0 : index
    %1 = vector.load %arg5[%c0_1, %c0_2] : memref<32x5xbf16, #tpu.memory_space<vmem>>, vector<32x5xbf16>
    %c0_3 = arith.constant 0 : index
    %c0_4 = arith.constant 0 : index
    %2 = vector.load %arg1[%c0_3, %c0_4] : memref<3x16xi32, #tpu.memory_space<vmem>>, vector<3x16xi32>
    %3 = tpu.iota {dimensions = array<i32: 0>} : vector<17x16xi32>
    %4 = tpu.iota {dimensions = array<i32: 0>} : vector<5x16xi32>
    %5 = vector.extract_strided_slice %2 {offsets = [0, 0], sizes = [1, 16], strides = [1, 1]} : vector<3x16xi32> to vector<1x16xi32>
    %6 = vector.extract_strided_slice %2 {offsets = [1, 0], sizes = [1, 16], strides = [1, 1]} : vector<3x16xi32> to vector<1x16xi32>
    %7 = vector.extract_strided_slice %2 {offsets = [2, 0], sizes = [1, 16], strides = [1, 1]} : vector<3x16xi32> to vector<1x16xi32>
    %8 = vector.broadcast %5 : vector<1x16xi32> to vector<17x16xi32>
    %9 = arith.cmpi eq, %8, %3 : vector<17x16xi32>
    %10 = arith.extui %9 : vector<17x16xi1> to vector<17x16xi32>
    %11 = arith.sitofp %10 : vector<17x16xi32> to vector<17x16xf32>
    %12 = arith.truncf %11 : vector<17x16xf32> to vector<17x16xbf16>
    %13 = vector.broadcast %7 : vector<1x16xi32> to vector<17x16xi32>
    %14 = arith.cmpi eq, %13, %3 : vector<17x16xi32>
    %15 = arith.extui %14 : vector<17x16xi1> to vector<17x16xi32>
    %16 = arith.sitofp %15 : vector<17x16xi32> to vector<17x16xf32>
    %17 = arith.truncf %16 : vector<17x16xf32> to vector<17x16xbf16>
    %18 = arith.subf %12, %17 : vector<17x16xbf16>
    %19 = vector.broadcast %6 : vector<1x16xi32> to vector<5x16xi32>
    %20 = arith.cmpi eq, %19, %4 : vector<5x16xi32>
    %21 = arith.extui %20 : vector<5x16xi1> to vector<5x16xi32>
    %22 = arith.sitofp %21 : vector<5x16xi32> to vector<5x16xf32>
    %23 = arith.truncf %22 : vector<5x16xf32> to vector<5x16xbf16>
    %cst = arith.constant dense<0.000000e+00> : vector<32x16xf32>
    %24 = tpu.matmul %0, %18, %cst {dimension_numbers = #tpu.dot_dimension_numbers<[1], [0], [0], [1], [0, 0, 1, 1], [], []>} : vector<32x17xbf16>, vector<17x16xbf16>, vector<32x16xf32> -> vector<32x16xf32>
    %cst_5 = arith.constant dense<0.000000e+00> : vector<32x16xf32>
    %25 = tpu.matmul %1, %23, %cst_5 {dimension_numbers = #tpu.dot_dimension_numbers<[1], [0], [0], [1], [0, 0, 1, 1], [], []>} : vector<32x5xbf16>, vector<5x16xbf16>, vector<32x16xf32> -> vector<32x16xf32>
    %26 = arith.addf %24, %25 : vector<32x16xf32>
    %27 = arith.mulf %26, %26 : vector<32x16xf32>
    %cst_6 = arith.constant dense<0.000000e+00> : vector<16xf32>
    %28 = vector.multi_reduction <add>, %27, %cst_6 [0] : vector<32x16xf32> to vector<16xf32>
    %29 = vector.shape_cast %28 : vector<16xf32> to vector<1x16xf32>
    %30 = vector.extract_strided_slice %29 {offsets = [0, 0], sizes = [1, 8], strides = [1, 1]} : vector<1x16xf32> to vector<1x8xf32>
    %cst_7 = arith.constant 1.000000e+00 : f32
    %31 = vector.broadcast %cst_7 : f32 to vector<1x8xf32>
    %32 = arith.addf %31, %30 : vector<1x8xf32>
    %33 = vector.extract_strided_slice %29 {offsets = [0, 8], sizes = [1, 8], strides = [1, 1]} : vector<1x16xf32> to vector<1x8xf32>
    %34 = arith.subf %32, %33 : vector<1x8xf32>
    %cst_8 = arith.constant 0.000000e+00 : f32
    %35 = vector.broadcast %cst_8 : f32 to vector<1x8xf32>
    %36 = arith.maximumf %34, %35 : vector<1x8xf32>
    %c0_9 = arith.constant 0 : index
    %c0_10 = arith.constant 0 : index
    %37 = memref.load %arg0[%c0_9, %c0_10] : memref<1x1xf32, #tpu.memory_space<smem>>
    %c0_11 = arith.constant 0 : index
    %c0_12 = arith.constant 0 : index
    %38 = vector.load %arg3[%c0_11, %c0_12] : memref<1x8xf32, #tpu.memory_space<vmem>>, vector<1x8xf32>
    %39 = vector.broadcast %37 : f32 to vector<1x8xf32>
    %40 = arith.addf %39, %38 : vector<1x8xf32>
    %41 = arith.mulf %40, %36 : vector<1x8xf32>
    %42 = vector.shape_cast %41 : vector<1x8xf32> to vector<1x1x8xf32>
    %cst_13 = arith.constant dense<0.000000e+00> : vector<1xf32>
    %43 = vector.multi_reduction <add>, %42, %cst_13 [1, 2] : vector<1x1x8xf32> to vector<1xf32>
    %44 = vector.shape_cast %43 : vector<1xf32> to vector<1x1x1xf32>
    %45 = vector.extract %44[0, 0, 0] : f32 from vector<1x1x1xf32>
    %c0_14 = arith.constant 0 : index
    %c0_15 = arith.constant 0 : index
    %46 = vector.load %arg7[%c0_14, %c0_15] : memref<256x32xbf16, #tpu.memory_space<vmem>>, vector<256x32xbf16>
    %cst_16 = arith.constant dense<0.000000e+00> : vector<256x17xf32>
    %47 = tpu.matmul %46, %0, %cst_16 {dimension_numbers = #tpu.dot_dimension_numbers<[1], [0], [0], [1], [0, 0, 1, 1], [], []>} : vector<256x32xbf16>, vector<32x17xbf16>, vector<256x17xf32> -> vector<256x17xf32>
    %c0_17 = arith.constant 0 : index
    %c0_18 = arith.constant 0 : index
    %48 = vector.load %arg6[%c0_17, %c0_18] : memref<256x17xbf16, #tpu.memory_space<vmem>>, vector<256x17xbf16>
    %49 = arith.extf %48 : vector<256x17xbf16> to vector<256x17xf32>
    %50 = arith.subf %47, %49 : vector<256x17xf32>
    %51 = tpu.iota {dimensions = array<i32: 0>} : vector<17x8xi32>
    %c0_19 = arith.constant 0 : index
    %c0_20 = arith.constant 0 : index
    %52 = vector.load %arg2[%c0_19, %c0_20] : memref<1x8xi32, #tpu.memory_space<vmem>>, vector<1x8xi32>
    %53 = vector.broadcast %52 : vector<1x8xi32> to vector<17x8xi32>
    %54 = arith.cmpi eq, %53, %51 : vector<17x8xi32>
    %55 = arith.extui %54 : vector<17x8xi1> to vector<17x8xi32>
    %56 = arith.sitofp %55 : vector<17x8xi32> to vector<17x8xf32>
    %57 = arith.truncf %56 : vector<17x8xf32> to vector<17x8xbf16>
    %58 = arith.truncf %50 : vector<256x17xf32> to vector<256x17xbf16>
    %cst_21 = arith.constant dense<0.000000e+00> : vector<256x8xf32>
    %59 = tpu.matmul %58, %57, %cst_21 {dimension_numbers = #tpu.dot_dimension_numbers<[1], [0], [0], [1], [0, 0, 1, 1], [], []>} : vector<256x17xbf16>, vector<17x8xbf16>, vector<256x8xf32> -> vector<256x8xf32>
    %60 = vector.extract_strided_slice %59 {offsets = [0, 0], sizes = [128, 8], strides = [1, 1]} : vector<256x8xf32> to vector<128x8xf32>
    %61 = arith.mulf %60, %60 : vector<128x8xf32>
    %cst_22 = arith.constant dense<0.000000e+00> : vector<8xf32>
    %62 = vector.multi_reduction <add>, %61, %cst_22 [0] : vector<128x8xf32> to vector<8xf32>
    %63 = vector.shape_cast %62 : vector<8xf32> to vector<1x8xf32>
    %64 = math.sqrt %63 : vector<1x8xf32>
    %65 = vector.shape_cast %64 : vector<1x8xf32> to vector<1x1x8xf32>
    %cst_23 = arith.constant dense<0.000000e+00> : vector<1xf32>
    %66 = vector.multi_reduction <add>, %65, %cst_23 [1, 2] : vector<1x1x8xf32> to vector<1xf32>
    %67 = vector.shape_cast %66 : vector<1xf32> to vector<1x1x1xf32>
    %68 = vector.extract %67[0, 0, 0] : f32 from vector<1x1x1xf32>
    %cst_24 = arith.constant 0.000000e+00 : f32
    %69 = arith.addf %cst_24, %68 : f32
    %70 = vector.extract_strided_slice %59 {offsets = [128, 0], sizes = [128, 8], strides = [1, 1]} : vector<256x8xf32> to vector<128x8xf32>
    %71 = arith.mulf %70, %70 : vector<128x8xf32>
    %cst_25 = arith.constant dense<0.000000e+00> : vector<8xf32>
    %72 = vector.multi_reduction <add>, %71, %cst_25 [0] : vector<128x8xf32> to vector<8xf32>
    %73 = vector.shape_cast %72 : vector<8xf32> to vector<1x8xf32>
    %74 = math.sqrt %73 : vector<1x8xf32>
    %75 = vector.shape_cast %74 : vector<1x8xf32> to vector<1x1x8xf32>
    %cst_26 = arith.constant dense<0.000000e+00> : vector<1xf32>
    %76 = vector.multi_reduction <add>, %75, %cst_26 [1, 2] : vector<1x1x8xf32> to vector<1xf32>
    %77 = vector.shape_cast %76 : vector<1xf32> to vector<1x1x1xf32>
    %78 = vector.extract %77[0, 0, 0] : f32 from vector<1x1x1xf32>
    %79 = arith.addf %69, %78 : f32
    %c0_27 = arith.constant 0 : index
    %c0_28 = arith.constant 0 : index
    %80 = vector.load %arg7[%c0_27, %c0_28] : memref<256x32xbf16, #tpu.memory_space<vmem>>, vector<256x32xbf16>
    %81 = arith.extf %80 : vector<256x32xbf16> to vector<256x32xf32>
    %82 = math.absf %81 : vector<256x32xf32>
    %83 = vector.shape_cast %82 : vector<256x32xf32> to vector<1x256x32xf32>
    %cst_29 = arith.constant dense<0.000000e+00> : vector<1xf32>
    %84 = vector.multi_reduction <add>, %83, %cst_29 [1, 2] : vector<1x256x32xf32> to vector<1xf32>
    %85 = vector.shape_cast %84 : vector<1xf32> to vector<1x1x1xf32>
    %86 = vector.extract %85[0, 0, 0] : f32 from vector<1x1x1xf32>
    %cst_30 = arith.constant 0.00999999977 : f32
    %87 = arith.mulf %cst_30, %86 : f32
    %88 = arith.addf %79, %87 : f32
    %cst_31 = arith.constant 1.000000e+00 : f32
    %89 = arith.mulf %cst_31, %45 : f32
    %90 = arith.addf %37, %37 : f32
    %91 = arith.divf %89, %90 : f32
    %92 = arith.addf %88, %91 : f32
    %c0_32 = arith.constant 0 : index
    %c0_33 = arith.constant 0 : index
    %93 = memref.load %arg8[%c0_32, %c0_33] : memref<1x1xf32, #tpu.memory_space<smem>>
    memref.store %92, %arg8[%c0_32, %c0_33] : memref<1x1xf32, #tpu.memory_space<smem>>
    %c0_34 = arith.constant 0 : index
    %c0_35 = arith.constant 0 : index
    %94 = memref.load %arg9[%c0_34, %c0_35] : memref<1x1xf32, #tpu.memory_space<smem>>
    memref.store %88, %arg9[%c0_34, %c0_35] : memref<1x1xf32, #tpu.memory_space<smem>>
    %c0_36 = arith.constant 0 : index
    %c0_37 = arith.constant 0 : index
    %95 = memref.load %arg10[%c0_36, %c0_37] : memref<1x1xf32, #tpu.memory_space<smem>>
    memref.store %45, %arg10[%c0_36, %c0_37] : memref<1x1xf32, #tpu.memory_space<smem>>
    return
  }
}

</mosaic_0001>

<bundles_post_ra>
// kernel: tpu_custom_call.1
= control target key start
LH: loop header
LB: loop body
LE: loop exit
PB: predicated region body
PF: predicated region fallthrough
CT: control target
= control target key end

     0   :  { %17 = vsyncpa [#allocation4], 0  ;;  %v45_v0 = vlaneseq  ;;  %vm106_vm0 = vcmask 1041408   ;;  %vm107_vm1 = vcmask 1042432   ;;  %vm99_vm2 = vcmask 39936   ;;  %s2046_s0 = inlined_call_operand.<no memory space> [shape: f32[1,1], index: 0, kind: input, shape index: {}]   ;;  %s2047_s1 = inlined_call_operand.vmem [shape: s32[3,16], index: 1, kind: input, shape index: {}]   ;;  %s2048_s2 = inlined_call_operand.vmem [shape: s32[1,8], index: 2, kind: input, shape index: {}]   ;;  %s2049_s3 = inlined_call_operand.vmem [shape: f32[1,8], index: 3, kind: input, shape index: {}]   ;;  %s2050_s4 = inlined_call_operand.vmem [shape: bf16[32,17], index: 4, kind: input, shape index: {}]   ;;  %s2051_s5 = inlined_call_operand.vmem [shape: bf16[32,5], index: 5, kind: input, shape index: {}]   ;;  %s2052_s6 = inlined_call_operand.vmem [shape: bf16[256,17], index: 6, kind: input, shape index: {}]   ;;  %s2053_s7 = inlined_call_operand.vmem [shape: bf16[256,32], index: 7, kind: input, shape index: {}]   ;;  %s2054_s8 = inlined_call_operand.hbm [shape: f32[1,1], index: 8, kind: output, shape index: {0}]   ;;  %s2055_s9 = inlined_call_operand.hbm [shape: f32[1,1], index: 9, kind: output, shape index: {1}]   ;;  %s2056_s10 = inlined_call_operand.hbm [shape: f32[1,1], index: 10, kind: output, shape index: {2}]  }
   0x1   :  { %v1567_v1 = vld [vmem:[%s2051_s5] sm:$0xff]   ;;  %v1643_v3 = vmov 65535   ;;  %vm179_vm3 = vcmask 1040384   ;;  %vm172_vm4 = vcmask 138240   ;;  %vm389_vm5 = vcmask 261120  }
   0x2   :  { %v1709_v2 = vshrl.u32 %v45_v0, 7  ;;  %v108_v4 = vsel %vm106_vm0, 4294967295, %v1643_v3  ;;  %1461 = vmatprep.mubr.msk.bf16.mxu1 %vm99_vm2, %v1567_v1  ;;  %v44_v5 = vld [vmem:[%s2047_s1] sm:$0x7]  ;;  %v1644_v19 = vmov 0.0  }
   0x3   :  { %v109_v10 = vsel %vm107_vm1, %v108_v4, 0  ;;  %v1724_v11 = vld [vmem:[%s2050_s4] sm:$0xff]  }
   0x4   :  { %v83_v6 = vsub.s32 1, %v1709_v2  ;;  %v1717_v7 = vadd.s32 8, %v1709_v2  ;;  %v51_v8 = vsub.s32 0, %v1709_v2  ;;  %v66_v9 = vsub.s32 2, %v1709_v2  ;;  %v1729_v15 = vld [vmem:[%s2053_s7] sm:$0xff]   ;;  %1469 = vmatprep.mubr.msk.bf16.mxu0 %vm172_vm4, %v1724_v11 }
   0x5   :  { %v1732_v16 = vadd.s32 16, %v1709_v2  ;;  %v1082_v17 = vunpack.c.l.bf16 %v1729_v15  ;;  %v1083_v18 = vunpack.c.h.bf16 %v1729_v15 }
   0x6   :  { %v84_v12 = vrot.slane %v44_v5, %v83_v6  ;;  %v52_v13 = vrot.slane %v44_v5, %v51_v8  ;;  %v67_v14 = vrot.slane %v44_v5, %v66_v9 }
   0x7   :  { %v1114_v28 = vand.u32 2147483647, %v1082_v17  ;;  %v1115_v32 = vand.u32 2147483647, %v1083_v18 }
   0x8   :  { %vm85_vm6 = vcmp.eq.s32.totalorder %v84_v12, %v1709_v2  ;;  %vm53_vm7 = vcmp.eq.s32.totalorder %v52_v13, %v1709_v2  ;;  %vm54_vm8 = vcmp.eq.s32.totalorder %v52_v13, %v1717_v7  ;;  %vm68_vm9 = vcmp.eq.s32.totalorder %v67_v14, %v1709_v2 }
   0x9   :  { %v1274_v20 = vsel %vm85_vm6, 1.0, %v1644_v19  ;;  %v1268_v21 = vsel %vm53_vm7, 1.0, %v1644_v19  ;;  %v1269_v22 = vsel %vm54_vm8, 1.0, %v1644_v19  ;;  %vm69_vm10 = vcmp.eq.s32.totalorder %v67_v14, %v1717_v7 }
   0xa   :  { %v88_v23 = vpack.c.bf16 %v1274_v20, %v1274_v20  ;;  %v62_v24 = vpack.c.bf16 %v1269_v22, %v1268_v21  ;;  %v1271_v25 = vsel %vm68_vm9, 1.0, %v1644_v19  ;;  %v1272_v26 = vsel %vm69_vm10, 1.0, %v1644_v19 }
   0xb   :  { %v77_v27 = vpack.c.bf16 %v1272_v26, %v1271_v25  ;;  %vm55_vm11 = vcmp.eq.s32.totalorder %v52_v13, %v1732_v16  ;;  %vm70_vm12 = vcmp.eq.s32.totalorder %v67_v14, %v1732_v16 }
   0xc   :  { %v111_v29 = vand.u32 %v109_v10, %v88_v23  ;;  %v1270_v30 = vsel %vm55_vm11, 1.0, %v1644_v19  ;;  %v1273_v31 = vsel %vm70_vm12, 1.0, %v1644_v19 }
   0xd   :  { %18 = vsyncpa [#allocation6], 0  ;;  %v79_v33 = vsub.bf16 %v62_v24, %v77_v27  ;;  %v63_v34 = vpack.c.bf16 %v1270_v30, %v1270_v30  ;;  %v78_v35 = vpack.c.bf16 %v1273_v31, %v1273_v31  ;;  %v1146_v36 = vsel %vm389_vm5, %v1114_v28, 0.0  ;;  %v277_v37 = vld [vmem:[%s2053_s7 + $0x8] sm:$0xff]   ;;  %v279_v44 = vld [vmem:[%s2053_s7 + $0x10] sm:$0xff]   ;;  %s1647_s24 = smov 120   ;;  %s1220_s21 = sadd.f32 %s2046_s0, %s2046_s0 }
   0xe   :  { %1459 = vmatprep.subr.bf16.mxu1 %v111_v29  ;;  %v1568_v38 = vld [vmem:[%s2051_s5 + $0x8] sm:$0xff]   ;;  %v1645_v39 = vmov 0   ;;  %v1147_v41 = vsel %vm389_vm5, %v1115_v32, 0.0  ;;  %v1084_v42 = vunpack.c.l.bf16 %v277_v37  ;;  %v1085_v43 = vunpack.c.h.bf16 %v277_v37  ;;  %v281_v52 = vld [vmem:[%s2053_s7 + $0x18] sm:$0xff]   ;;  %v283_v61 = vld [vmem:[%s2053_s7 + $0x20] sm:$0xff]   ;;  %s1609_s29 = scalar_lea.hbm %s2055_s9, 16 }
   0xf   :  { %v1760_v40 = vsel %vm179_vm3, 65535, %v1645_v39  ;;  %1465 = vmatprep.subr.bf16.mxu0 %v79_v33  ;;  %1460 = vmatpush3.bf16.msra.mxu1 %v111_v29  ;;  %v80_v45 = vsub.bf16 %v63_v34, %v78_v35  ;;  %v1148_v46 = vadd.f32 %v1147_v41, %v1146_v36  ;;  %v1086_v47 = vunpack.c.l.bf16 %v279_v44  ;;  %v1570_v48 = vld [vmem:[%s2050_s4 + $0x8] sm:$0xff]   ;;  %v287_v18 = vld [vmem:[%s2053_s7 + $0x30] sm:$0xff]   ;;  %v289_v28 = vld [vmem:[%s2053_s7 + $0x38] sm:$0xff]   ;;  %p1610_p0 = scmp.ne.s32.totalorder %s2055_s9, %s1609_s29  ;;  %p1613_p1 = scmp.lt.u32.totalorder %s1609_s29, %s2055_s9 }
  0x10   :  { %1466 = vmatpush3.bf16.msra.mxu0 %v79_v33  ;;  %1473 = vmatprep.subr.bf16.mxu1 %v1724_v11  ;;  %v1116_v49 = vand.u32 2147483647, %v1084_v42  ;;  %v1117_v50 = vand.u32 2147483647, %v1085_v43  ;;  %v1087_v51 = vunpack.c.h.bf16 %v279_v44  ;;  %v1088_v55 = vunpack.c.l.bf16 %v281_v52  ;;  %v285_v8 = vld [vmem:[%s2053_s7 + $0x28] sm:$0xff]  }
  0x11   :  { %v183_v53 = vand.u32 %v1760_v40, %v80_v45  ;;  %v1118_v54 = vand.u32 2147483647, %v1086_v47  ;;  %v1089_v59 = vunpack.c.h.bf16 %v281_v52  ;;  %v1090_v0 = vunpack.c.l.bf16 %v283_v61  ;;  %v293_v47 = vld [vmem:[%s2053_s7 + $0x48] sm:$0xff]   ;;  %p1615_p2 = pnand %p1613_p1, %p1610_p0 }
  0x12   :  { %1462 = vmatmul.mubr.msk.bf16.vlgmr.msra.gmra.mrb[0].mxu1 %vm99_vm2, %v1568_v38  ;;  %v1149_v56 = vsel %vm389_vm5, %v1116_v49, 0.0  ;;  %v1119_v57 = vand.u32 2147483647, %v1087_v51  ;;  %v1151_v58 = vsel %vm389_vm5, %v1117_v50, 0.0  ;;  %v1120_v63 = vand.u32 2147483647, %v1088_v55 }
  0x13   :  { %1467 = vmatprep.subr.bf16.mxu0 %v183_v53  ;;  %1474 = vmatpush3.bf16.msra.mxu1 %v1724_v11  ;;  %v1150_v60 = vadd.f32 %v1149_v56, %v1148_v46  ;;  %v1153_v62 = vsel %vm389_vm5, %v1118_v54, 0.0  ;;  %v1121_v4 = vand.u32 2147483647, %v1089_v59  ;;  %v1091_v5 = vunpack.c.h.bf16 %v283_v61  ;;  %v295_v56 = vld [vmem:[%s2053_s7 + $0x50] sm:$0xff]  }
  0x14   :  { %1468 = vmatpush3.bf16.msra.mxu0 %v183_v53  ;;  %1475 = vmatprep.subr.bf16.mxu1 %v1570_v48  ;;  %v1155_v3 = vsel %vm389_vm5, %v1119_v57, 0.0  ;;  %v1157_v9 = vsel %vm389_vm5, %v1120_v63, 0.0  ;;  %v1122_v10 = vand.u32 2147483647, %v1090_v0  ;;  %v1092_v11 = vunpack.c.l.bf16 %v285_v8 }
  0x15   :  { %1477 = vmatprep.mubr.msk.bf16.mxu1 %vm389_vm5, %v1729_v15  ;;  %v1152_v1 = vadd.f32 %v1151_v58, %v1150_v60  ;;  %v1159_v13 = vsel %vm389_vm5, %v1121_v4, 0.0  ;;  %v1123_v14 = vand.u32 2147483647, %v1091_v5  ;;  %v1093_v15 = vunpack.c.h.bf16 %v285_v8 }
  0x16   :  { %v1161_v20 = vsel %vm389_vm5, %v1122_v10, 0.0  ;;  %v1124_v21 = vand.u32 2147483647, %v1092_v11  ;;  %v1094_v22 = vunpack.c.l.bf16 %v287_v18  ;;  %v1095_v26 = vunpack.c.h.bf16 %v287_v18 }
  0x17   :  { %1470 = vmatmul.mubr.msk.bf16.vlgmr.msra.gmra.mrb[0].mxu0 %vm172_vm4, %v1570_v48  ;;  %1476 = vmatpush3.bf16.msra.mxu1 %v1570_v48  ;;  %v1154_v6 = vadd.f32 %v1153_v62, %v1152_v1  ;;  %v1163_v24 = vsel %vm389_vm5, %v1123_v14, 0.0  ;;  %v1125_v25 = vand.u32 2147483647, %v1093_v15  ;;  %v1096_v31 = vunpack.c.l.bf16 %v289_v28  ;;  %v297_v1 = vld [vmem:[%s2053_s7 + $0x58] sm:$0xff]  }
  0x18   :  { %v1165_v29 = vsel %vm389_vm5, %v1124_v21, 0.0  ;;  %v1126_v30 = vand.u32 2147483647, %v1094_v22  ;;  %v1127_v34 = vand.u32 2147483647, %v1095_v26  ;;  %v1097_v35 = vunpack.c.h.bf16 %v289_v28 }
  0x19   :  { %v1156_v12 = vadd.f32 %v1155_v3, %v1154_v6  ;;  %v1167_v33 = vsel %vm389_vm5, %v1125_v25, 0.0  ;;  %v1128_v39 = vand.u32 2147483647, %v1096_v31  ;;  %v1100_v50 = vunpack.c.l.bf16 %v293_v47 }
  0x1a   :  { %1478 = vmatmul.mubr.msk.bf16.vlgmr.msra.gmra.mrb[4].mxu1 %vm389_vm5, %v277_v37  ;;  %v291_v37 = vld [vmem:[%s2053_s7 + $0x40] sm:$0xff]   ;;  %v1169_v38 = vsel %vm389_vm5, %v1126_v30, 0.0  ;;  %v1171_v43 = vsel %vm389_vm5, %v1127_v34, 0.0  ;;  %v1101_v54 = vunpack.c.h.bf16 %v293_v47  ;;  %v1102_v59 = vunpack.c.l.bf16 %v295_v56  ;;  %v1847_v34 = vld [vmem:[%s2053_s7 + $0x68] sm:$0xff]  }
  0x1b   :  { %1481 = vmatprep.mubr.msk.bf16.mxu1 %vm389_vm5, %v279_v44  ;;  %v1158_v17 = vadd.f32 %v1157_v9, %v1156_v12  ;;  %v1098_v41 = vunpack.c.l.bf16 %v291_v37  ;;  %v1129_v44 = vand.u32 2147483647, %v1097_v35  ;;  %v1099_v45 = vunpack.c.h.bf16 %v291_v37  ;;  %v299_v12 = vld [vmem:[%s2053_s7 + $0x60] sm:$0xff]   ;;  %v1852_v35 = vld [vmem:[%s2053_s7 + $0x70] sm:$0xff]  }
  0x1c   :  { %v1173_v48 = vsel %vm389_vm5, %v1128_v39, 0.0  ;;  %v1132_v58 = vand.u32 2147483647, %v1100_v50  ;;  %v1133_v62 = vand.u32 2147483647, %v1101_v54  ;;  %v1103_v63 = vunpack.c.h.bf16 %v295_v56 }
  0x1d   :  { %v1160_v23 = vadd.f32 %v1159_v13, %v1158_v17  ;;  %v1130_v49 = vand.u32 2147483647, %v1098_v41  ;;  %v1131_v53 = vand.u32 2147483647, %v1099_v45  ;;  %v1134_v4 = vand.u32 2147483647, %v1102_v59 }
  0x1e   :  { %v1181_v3 = vsel %vm389_vm5, %v1132_v58, 0.0  ;;  %v1104_v5 = vunpack.c.l.bf16 %v297_v1  ;;  %v1135_v9 = vand.u32 2147483647, %v1103_v63  ;;  %v1105_v10 = vunpack.c.h.bf16 %v297_v1 }
  0x1f   :  { %v1162_v27 = vadd.f32 %v1161_v20, %v1160_v23  ;;  %v1177_v57 = vsel %vm389_vm5, %v1130_v49, 0.0  ;;  %v1185_v13 = vsel %vm389_vm5, %v1134_v4, 0.0  ;;  %v1106_v15 = vunpack.c.l.bf16 %v299_v12  ;;  %v1403_v4 = vld [vmem:[%s2052_s6 + $0x18] sm:$0xff]  }
  0x20   :  { %v1136_v14 = vand.u32 2147483647, %v1104_v5  ;;  %v1137_v20 = vand.u32 2147483647, %v1105_v10  ;;  %v1107_v21 = vunpack.c.h.bf16 %v299_v12  ;;  %vm238_vm1 = vcmask 130048   ;;  %v1402_v10 = vld [vmem:[%s2052_s6 + $0x10] sm:$0xff]  }
  0x21   :  { %v1164_v32 = vadd.f32 %v1163_v24, %v1162_v27  ;;  %v1138_v24 = vand.u32 2147483647, %v1106_v15  ;;  %v1352_v15 = vunpack.c.h.bf16 %v1403_v4  ;;  %vm264_vm2 = vcmask 57344  }
  0x22   :  { %1482 = vmatmul.mubr.msk.bf16.gmra.mrb[8].mxu1 %vm389_vm5, %v281_v52  ;;  %v1175_v52 = vsel %vm389_vm5, %v1129_v44, 0.0  ;;  %v1189_v23 = vsel %vm389_vm5, %v1136_v14, 0.0  ;;  %v1191_v26 = vsel %vm389_vm5, %v1137_v20, 0.0  ;;  %v1139_v27 = vand.u32 2147483647, %v1107_v21 }
  0x23   :  { %1485 = vmatprep.mubr.msk.bf16.mxu1 %vm389_vm5, %v283_v61  ;;  %v1166_v36 = vadd.f32 %v1165_v29, %v1164_v32  ;;  %v1179_v61 = vsel %vm389_vm5, %v1131_v53, 0.0  ;;  %v1193_v29 = vsel %vm389_vm5, %v1138_v24, 0.0  ;;  %v1351_v14 = vunpack.c.l.bf16 %v1403_v4 }
  0x24   :  { %v1195_v31 = vsel %vm389_vm5, %v1139_v27, 0.0  ;;  %v1347_v20 = vunpack.c.l.bf16 %v1402_v10  ;;  %v1348_v21 = vunpack.c.h.bf16 %v1402_v10  ;;  %vm955_vm3 = vcmask 64512  }
  0x25   :  { %v1168_v42 = vadd.f32 %v1167_v33, %v1166_v36  ;;  %v1861_v36 = vld [vmem:[%s2053_s7 + $0x78] sm:$0xff]  }
  0x27   :  { %v1170_v46 = vadd.f32 %v1169_v38, %v1168_v42  ;;  %v1646_v38 = vmov 1.0|1.0  }
  0x29   :  { %v1172_v51 = vadd.f32 %v1171_v43, %v1170_v46 }
  0x2a   :  { %1486 = vmatmul.mubr.msk.bf16.gmra.mrb[12].mxu1 %vm389_vm5, %v285_v8  ;;  %v1183_v8 = vsel %vm389_vm5, %v1133_v62, 0.0 }
  0x2b   :  { %1489 = vmatprep.mubr.msk.bf16.mxu1 %vm389_vm5, %v287_v18  ;;  %v1174_v55 = vadd.f32 %v1173_v48, %v1172_v51  ;;  %v1187_v18 = vsel %vm389_vm5, %v1135_v9, 0.0 }
  0x2d   :  { %v1176_v60 = vadd.f32 %v1175_v52, %v1174_v55 }
  0x2f   :  { %v1178_v0 = vadd.f32 %v1177_v57, %v1176_v60 }
  0x31   :  { %v1180_v6 = vadd.f32 %v1179_v61, %v1178_v0 }
  0x32   :  { %1490 = vmatmul.mubr.msk.bf16.gmra.mrb[16].mxu1 %vm389_vm5, %v289_v28 }
  0x33   :  { %1493 = vmatprep.mubr.msk.bf16.mxu1 %vm389_vm5, %v291_v37  ;;  %v1182_v11 = vadd.f32 %v1181_v3, %v1180_v6  ;;  %v1315_v37 = vld [vmem:[%s2048_s2] ss:$0 sm:$0xff] }
  0x34   :  { %vm700_vm13 = vcmp.eq.s32.totalorder %v1315_v37, %v1709_v2  ;;  %vm701_vm14 = vcmp.eq.s32.totalorder %v1315_v37, %v1717_v7  ;;  %vm702_vm0 = vcmp.eq.s32.totalorder %v1315_v37, %v1732_v16  ;;  %v1401_v2 = vld [vmem:[%s2052_s6 + $0x8] sm:$0xff]   ;;  %v1338_v16 = vld [vmem:[%s2052_s6] sm:$0xff]  }
  0x35   :  { %v1184_v17 = vadd.f32 %v1183_v8, %v1182_v11  ;;  %vm1319_vm15 = vmpackc.low %vm701_vm14, %vm700_vm13  ;;  %v1318_v39 = vsel %vm702_vm0, 1.0, %v1644_v19  ;;  %v1344_v50 = vunpack.c.h.bf16 %v1401_v2  ;;  %v1339_v54 = vunpack.c.l.bf16 %v1338_v16 }
  0x36   :  { %1509 = vmatprep.subr.msk.bf16.mxu0 %vm1319_vm15, %v1646_v38  ;;  %v710_v41 = vpack.c.bf16 %v1318_v39, %v1318_v39  ;;  %v1340_v55 = vunpack.c.h.bf16 %v1338_v16 }
  0x37   :  { %v1186_v22 = vadd.f32 %v1185_v13, %v1184_v17  ;;  %1510 = vmatpush3.bf16.msk.msra.mxu0 %vm1319_vm15, %v1646_v38  ;;  %v1404_v38 = vld [vmem:[%s2052_s6 + $0x20] sm:$0xff]  }
  0x38   :  { %v776_v42 = vand.u32 %v710_v41, %v1760_v40  ;;  %v1343_v40 = vunpack.c.l.bf16 %v1401_v2 }
  0x39   :  { %v1188_v25 = vadd.f32 %v1187_v18, %v1186_v22 }
  0x3a   :  { %1494 = vmatmul.mubr.msk.bf16.gmra.mrb[20].mxu1 %vm389_vm5, %v293_v47  ;;  %1511 = vmatprep.subr.bf16.mxu0 %v776_v42 }
  0x3b   :  { %1497 = vmatprep.mubr.msk.bf16.mxu1 %vm389_vm5, %v295_v56  ;;  %v1190_v28 = vadd.f32 %v1189_v23, %v1188_v25  ;;  %1512 = vmatpush3.bf16.msra.mxu0 %v776_v42 }
  0x3d   :  { %v1192_v30 = vadd.f32 %v1191_v26, %v1190_v28 }
  0x3f   :  { %v1194_v32 = vadd.f32 %v1193_v29, %v1192_v30 }
  0x41   :  { %v1840_v33 = vadd.f32 %v1195_v31, %v1194_v32  ;;  %v1405_v31 = vld [vmem:[%s2052_s6 + $0x28] sm:$0xff]  }
  0x42   :  { %1498 = vmatmul.mubr.msk.bf16.gmra.mrb[24].mxu1 %vm389_vm5, %v297_v1  ;;  %v1359_v42 = vunpack.c.l.bf16 %v1405_v31 }
  0x43   :  { %1501 = vmatprep.mubr.msk.bf16.mxu1 %vm389_vm5, %v299_v12 }
  0x4a   :  { %1502 = vmatmul.mubr.msk.bf16.gmra.mrb[28].mxu1 %vm389_vm5, %v1847_v34 }
  0x4b   :  { %1505 = vmatprep.mubr.msk.bf16.mxu1 %vm389_vm5, %v1852_v35 }
  0x52   :  { %1506 = vmatmul.mubr.msk.bf16.gmra.mrb[32].mxu1 %vm389_vm5, %v1861_v36 }
  0xe5   :  { %v1463_v43 = vpop.f32.mrb[0].mxu1 }
  0xe6   :  { %v147_v44 = vpop.f32.mrb[1].mxu1 }
  0xe7   :  { %v1464_v45 = vpop.f32.mrb[2].mxu1 }
  0xe8   :  { %v150_v46 = vpop.f32.mrb[3].mxu1 }
  0xea   :  { %v1471_v7 = vpop.f32.mrb[0].mxu0 }
  0xeb   :  { %v228_v19 = vadd.f32 %v1471_v7, %v1463_v43  ;;  %v219_v47 = vpop.f32.mrb[1].mxu0  ;;  %v1360_v43 = vunpack.c.h.bf16 %v1405_v31 }
  0xec   :  { %v220_v48 = vadd.f32 %v219_v47, %v147_v44  ;;  %v1472_v49 = vpop.f32.mrb[2].mxu0 }
  0xed   :  { %v231_v51 = vadd.f32 %v1472_v49, %v1464_v45  ;;  %v222_v52 = vpop.f32.mrb[3].mxu0  ;;  %v1479_v53 = vpop.f32.mrb[4].mxu1  ;;  %v236_v60 = vmul.f32 %v228_v19, %v228_v19  ;;  %v1355_v45 = vunpack.c.l.bf16 %v1404_v38 }
  0xee   :  { %v234_v56 = vmul.f32 %v220_v48, %v220_v48  ;;  %v223_v57 = vadd.f32 %v222_v52, %v150_v46  ;;  %v472_v58 = vpop.f32.mrb[5].mxu1  ;;  %v665_v62 = vsub.f32 %v1479_v53, %v1343_v40  ;;  %v1356_v46 = vunpack.c.h.bf16 %v1404_v38  ;;  %v1407_v52 = vld [vmem:[%s2052_s6 + $0x38] sm:$0xff]  }
  0xef   :  { %v1480_v59 = vpop.f32.mrb[6].mxu1  ;;  %v663_v1 = vsub.f32 %v472_v58, %v1339_v54  ;;  %v237_v6 = vmul.f32 %v231_v51, %v231_v51  ;;  %v242_v13 = vsel %vm238_vm1, %v236_v60, 0.0  ;;  %v1406_v54 = vld [vmem:[%s2052_s6 + $0x30] sm:$0xff]   ;;  %v1368_v58 = vunpack.c.h.bf16 %v1407_v52 }
  0xf0   :  { %v235_v61 = vmul.f32 %v223_v57, %v223_v57  ;;  %v666_v63 = vsub.f32 %v1480_v59, %v1344_v50  ;;  %v475_v0 = vpop.f32.mrb[7].mxu1  ;;  %v239_v5 = vsel %vm238_vm1, %v234_v56, 0.0  ;;  %v1367_v57 = vunpack.c.l.bf16 %v1407_v52 }
  0xf1   :  { %v664_v3 = vsub.f32 %v475_v0, %v1340_v55  ;;  %v244_v22 = vsel %vm238_vm1, %v237_v6, 0.0  ;;  %v1363_v60 = vunpack.c.l.bf16 %v1406_v54  ;;  %v1409_v6 = vld [vmem:[%s2052_s6 + $0x48] sm:$0xff]  }
  0xf2   :  { %v240_v8 = vsel %vm238_vm1, %v235_v61, 0.0  ;;  %v712_v9 = vpack.c.bf16 %v666_v63, %v665_v62  ;;  %v1364_v61 = vunpack.c.h.bf16 %v1406_v54 }
  0xf3   :  { %v241_v11 = vadd.f32 %v240_v8, %v239_v5  ;;  %v711_v12 = vpack.c.bf16 %v664_v3, %v663_v1 }
  0xf5   :  { %v243_v17 = vadd.f32 %v242_v13, %v241_v11  ;;  %v1483_v18 = vpop.f32.mrb[8].mxu1  ;;  %1513 = vmatprep.mubr.msk.bf16.mxu0 %vm172_vm4, %v711_v12  ;;  %v1375_v11 = vunpack.c.l.bf16 %v1409_v6  ;;  %v1376_v12 = vunpack.c.h.bf16 %v1409_v6 }
  0xf6   :  { %v488_v23 = vpop.f32.mrb[9].mxu1  ;;  %1514 = vmatmul.mubr.msk.bf16.vlgmr.msra.gmra.mrb[4].mxu0 %vm172_vm4, %v712_v9  ;;  %v669_v26 = vsub.f32 %v1483_v18, %v1351_v14  ;;  %v1408_v9 = vld [vmem:[%s2052_s6 + $0x40] sm:$0xff]  }
  0xf7   :  { %v1484_v24 = vpop.f32.mrb[10].mxu1  ;;  %v245_v25 = vadd.f32 %v244_v22, %v243_v17  ;;  %v667_v29 = vsub.f32 %v488_v23, %v1347_v20  ;;  %v1371_v14 = vunpack.c.l.bf16 %v1408_v9 }
  0xf8   :  { %v670_v27 = vsub.f32 %v1484_v24, %v1352_v15  ;;  %v491_v28 = vpop.f32.mrb[11].mxu1  ;;  %v1372_v15 = vunpack.c.h.bf16 %v1408_v9 }
  0xf9   :  { %v668_v30 = vsub.f32 %v491_v28, %v1348_v21  ;;  %v246_v32 = vrot.slane %v245_v25, 4 }
  0xfa   :  { %v714_v37 = vpack.c.bf16 %v670_v27, %v669_v26  ;;  %v1410_v27 = vld [vmem:[%s2052_s6 + $0x50] sm:$0xff]  }
  0xfb   :  { %v713_v39 = vpack.c.bf16 %v668_v30, %v667_v29  ;;  %v247_v41 = vadd.f32 %v246_v32, %v245_v25  ;;  %v1411_v25 = vld [vmem:[%s2052_s6 + $0x58] sm:$0xff]   ;;  %v1379_v32 = vunpack.c.l.bf16 %v1410_v27 }
  0xfc   :  { %v1383_v29 = vunpack.c.l.bf16 %v1411_v25  ;;  %v1384_v30 = vunpack.c.h.bf16 %v1411_v25  ;;  %v1108_v25 = vunpack.c.l.bf16 %v1847_v34 }
  0xfd   :  { %v1487_v44 = vpop.f32.mrb[12].mxu1  ;;  %1517 = vmatprep.mubr.msk.bf16.mxu0 %vm172_vm4, %v713_v39  ;;  %v248_v2 = vrot.slane %v247_v41, 2 }
  0xfe   :  { %v504_v7 = vpop.f32.mrb[13].mxu1  ;;  %1518 = vmatmul.mubr.msk.bf16.gmra.mrb[8].mxu0 %vm172_vm4, %v714_v37  ;;  %v673_v47 = vsub.f32 %v1487_v44, %v1359_v42  ;;  %v1380_v37 = vunpack.c.h.bf16 %v1410_v27  ;;  %v1140_v27 = vand.u32 2147483647, %v1108_v25 }
  0xff   :  { %v1488_v16 = vpop.f32.mrb[14].mxu1  ;;  %v249_v19 = vadd.f32 %v248_v2, %v247_v41  ;;  %v671_v40 = vsub.f32 %v504_v7, %v1355_v45  ;;  %v1412_v7 = vld [vmem:[%s2052_s6 + $0x60] sm:$0xff]  }
 0x100   :  { %v674_v48 = vsub.f32 %v1488_v16, %v1360_v43  ;;  %v507_v49 = vpop.f32.mrb[15].mxu1 }
 0x101   :  { %v672_v50 = vsub.f32 %v507_v49, %v1356_v46  ;;  %v250_v51 = vrot.slane %v249_v19, 1  ;;  %v1413_v46 = vld [vmem:[%s2052_s6 + $0x68] sm:$0xff]   ;;  %v1387_v49 = vunpack.c.l.bf16 %v1412_v7 }
 0x102   :  { %v716_v53 = vpack.c.bf16 %v674_v48, %v673_v47  ;;  %v1392_v47 = vunpack.c.h.bf16 %v1413_v46 }
 0x103   :  { %v715_v55 = vpack.c.bf16 %v672_v50, %v671_v40  ;;  %v1905_v56 = vadd.f32 %v250_v51, %v249_v19  ;;  %v1391_v19 = vunpack.c.l.bf16 %v1413_v46  ;;  %v1388_v40 = vunpack.c.h.bf16 %v1412_v7 }
 0x105   :  { %254 = vrot.lane.b32.xlu0 %v1905_v56, %s1647_s24  ;;  %v1491_v59 = vpop.f32.mrb[16].mxu1  ;;  %1521 = vmatprep.mubr.msk.bf16.mxu0 %vm172_vm4, %v715_v55 }
 0x106   :  { %v520_v62 = vpop.f32.mrb[17].mxu1  ;;  %1522 = vmatmul.mubr.msk.bf16.gmra.mrb[12].mxu0 %vm172_vm4, %v716_v53  ;;  %v677_v0 = vsub.f32 %v1491_v59, %v1367_v57 }
 0x107   :  { %v1492_v63 = vpop.f32.mrb[18].mxu1  ;;  %v675_v4 = vsub.f32 %v520_v62, %v1363_v60  ;;  %v1414_v60 = vld [vmem:[%s2052_s6 + $0x70] sm:$0xff]  }
 0x108   :  { %v678_v1 = vsub.f32 %v1492_v63, %v1368_v58  ;;  %v523_v3 = vpop.f32.mrb[19].mxu1  ;;  %v1415_v58 = vld [vmem:[%s2052_s6 + $0x78] sm:$0xff]  }
 0x109   :  { %v676_v5 = vsub.f32 %v523_v3, %v1364_v61  ;;  %v1399_v62 = vunpack.c.l.bf16 %v1415_v58  ;;  %v1400_v63 = vunpack.c.h.bf16 %v1415_v58  ;;  %v1396_v3 = vunpack.c.h.bf16 %v1414_v60 }
 0x10a   :  { %v718_v8 = vpack.c.bf16 %v678_v1, %v677_v0  ;;  %v1395_v1 = vunpack.c.l.bf16 %v1414_v60 }
 0x10b   :  { %v717_v10 = vpack.c.bf16 %v676_v5, %v675_v4 }
 0x10d   :  { %v1495_v13 = vpop.f32.mrb[20].mxu1  ;;  %1525 = vmatprep.mubr.msk.bf16.mxu0 %vm172_vm4, %v717_v10 }
 0x10e   :  { %v536_v17 = vpop.f32.mrb[21].mxu1  ;;  %1526 = vmatmul.mubr.msk.bf16.gmra.mrb[16].mxu0 %vm172_vm4, %v718_v8  ;;  %v681_v20 = vsub.f32 %v1495_v13, %v1375_v11 }
 0x10f   :  { %v1496_v18 = vpop.f32.mrb[22].mxu1  ;;  %v679_v23 = vsub.f32 %v536_v17, %v1371_v14  ;;  %v260_v14 = vld [vmem:[%s2049_s3] sm:$0x1]  ;;  %v252_v17 = vadd.f32 1.0, %v1905_v56 }
 0x110   :  { %v682_v21 = vsub.f32 %v1496_v18, %v1376_v12  ;;  %v539_v22 = vpop.f32.mrb[23].mxu1 }
 0x111   :  { %v680_v24 = vsub.f32 %v539_v22, %v1372_v15  ;;  %v261_v15 = vstv %s2046_s0 }
 0x112   :  { %v720_v26 = vpack.c.bf16 %v682_v21, %v681_v20  ;;  %v262_v21 = vadd.f32 %v261_v15, %v260_v14 }
 0x113   :  { %v719_v28 = vpack.c.bf16 %v680_v24, %v679_v23 }
 0x115   :  { %v1499_v31 = vpop.f32.mrb[24].mxu1  ;;  %1529 = vmatprep.mubr.msk.bf16.mxu0 %vm172_vm4, %v719_v28 }
 0x116   :  { %v552_v38 = vpop.f32.mrb[25].mxu1  ;;  %1530 = vmatmul.mubr.msk.bf16.gmra.mrb[20].mxu0 %vm172_vm4, %v720_v26  ;;  %v685_v41 = vsub.f32 %v1499_v31, %v1383_v29  ;;  %v1109_v26 = vunpack.c.h.bf16 %v1847_v34  ;;  %v1197_v29 = vsel %vm389_vm5, %v1140_v27, 0.0 }
 0x117   :  { %v1500_v39 = vpop.f32.mrb[26].mxu1  ;;  %v683_v44 = vsub.f32 %v552_v38, %v1379_v32 }
 0x118   :  { %v686_v42 = vsub.f32 %v1500_v39, %v1384_v30  ;;  %v555_v43 = vpop.f32.mrb[27].mxu1  ;;  %v1141_v28 = vand.u32 2147483647, %v1109_v26  ;;  %v1198_v30 = vadd.f32 %v1197_v29, %v1840_v33 }
 0x119   :  { %v684_v45 = vsub.f32 %v555_v43, %v1380_v37 }
 0x11a   :  { %v722_v2 = vpack.c.bf16 %v686_v42, %v685_v41  ;;  %v1199_v56 = vsel %vm389_vm5, %v1141_v28, 0.0 }
 0x11b   :  { %v721_v16 = vpack.c.bf16 %v684_v45, %v683_v44  ;;  %v1957_v31 = vadd.f32 %v1199_v56, %v1198_v30 }
 0x11d   :  { %v1503_v48 = vpop.f32.mrb[28].mxu1  ;;  %1533 = vmatprep.mubr.msk.bf16.mxu0 %vm172_vm4, %v721_v16 }
 0x11e   :  { %v568_v50 = vpop.f32.mrb[29].mxu1  ;;  %1534 = vmatmul.mubr.msk.bf16.gmra.mrb[24].mxu0 %vm172_vm4, %v722_v2  ;;  %v689_v52 = vsub.f32 %v1503_v48, %v1391_v19 }
 0x11f   :  { %v1504_v51 = vpop.f32.mrb[30].mxu1  ;;  %v687_v55 = vsub.f32 %v568_v50, %v1387_v49 }
 0x120   :  { %v690_v53 = vsub.f32 %v1504_v51, %v1392_v47  ;;  %v571_v54 = vpop.f32.mrb[31].mxu1 }
 0x121   :  { %v688_v57 = vsub.f32 %v571_v54, %v1388_v40 }
 0x122   :  { %v724_v59 = vpack.c.bf16 %v690_v53, %v689_v52 }
 0x123   :  { %v723_v61 = vpack.c.bf16 %v688_v57, %v687_v55 }
 0x125   :  { %v1507_v0 = vpop.f32.mrb[32].mxu1  ;;  %1537 = vmatprep.mubr.msk.bf16.mxu0 %vm172_vm4, %v723_v61 }
 0x126   :  { %v584_v4 = vpop.f32.mrb[33].mxu1  ;;  %1538 = vmatmul.mubr.msk.bf16.gmra.mrb[28].mxu0 %vm172_vm4, %v724_v59  ;;  %v693_v6 = vsub.f32 %v1507_v0, %v1399_v62 }
 0x127   :  { %v1508_v5 = vpop.f32.mrb[34].mxu1  ;;  %v691_v10 = vsub.f32 %v584_v4, %v1395_v1 }
 0x128   :  { %v694_v8 = vsub.f32 %v1508_v5, %v1400_v63  ;;  %v587_v9 = vpop.f32.mrb[35].mxu1 }
 0x129   :  { %v692_v11 = vsub.f32 %v587_v9, %v1396_v3 }
 0x12a   :  { %v726_v12 = vpack.c.bf16 %v694_v8, %v693_v6 }
 0x12b   :  { %v725_v13 = vpack.c.bf16 %v692_v11, %v691_v10 }
 0x12d   :  { %1541 = vmatprep.mubr.msk.bf16.mxu0 %vm172_vm4, %v725_v13 }
 0x12e   :  { %1542 = vmatmul.mubr.msk.bf16.gmra.mrb[32].mxu0 %vm172_vm4, %v726_v12 }
 0x177   :  { %v255_v18 = vpop.permute.xlu0 %254 }
 0x178   :  { %v257_v20 = vsub.f32 %v252_v17, %v255_v18 }
 0x17a   :  { %v258_v22 = vmax.f32 %v257_v20, 0.0 }
 0x17c   :  { %v263_v23 = vmul.f32 %v262_v21, %v258_v22 }
 0x17e   :  { %v265_v24 = vsel %vm264_vm2, %v263_v23, 0.0 }
 0x17f   :  { %266 = vadd.xlane.f32.xlu0 %v265_v24 }
 0x1c9   :  { %v1515_v32 = vpop.f32.mrb[4].mxu0 }
 0x1ca   :  { %v812_v37 = vpop.f32.mrb[5].mxu0  ;;  %v941_v42 = vmul.f32 %v1515_v32, %v1515_v32 }
 0x1cb   :  { %v939_v38 = vmul.f32 %v812_v37, %v812_v37  ;;  %v1516_v39 = vpop.f32.mrb[6].mxu0 }
 0x1cc   :  { %v815_v41 = vpop.f32.mrb[7].mxu0  ;;  %v942_v44 = vmul.f32 %v1516_v39, %v1516_v39  ;;  %v959_v33 = vsel %vm955_vm3, %v941_v42, 0.0 }
 0x1cd   :  { %v940_v43 = vmul.f32 %v815_v41, %v815_v41  ;;  %v956_v34 = vsel %vm955_vm3, %v939_v38, 0.0 }
 0x1ce   :  { %v961_v19 = vsel %vm955_vm3, %v942_v44, 0.0 }
 0x1cf   :  { %v957_v45 = vsel %vm955_vm3, %v940_v43, 0.0 }
 0x1d0   :  { %v958_v46 = vadd.f32 %v957_v45, %v956_v34 }
 0x1d1   :  { %v1519_v2 = vpop.f32.mrb[8].mxu0 }
 0x1d2   :  { %v960_v7 = vadd.f32 %v959_v33, %v958_v46  ;;  %v828_v16 = vpop.f32.mrb[9].mxu0  ;;  %v945_v50 = vmul.f32 %v1519_v2, %v1519_v2 }
 0x1d3   :  { %v943_v47 = vmul.f32 %v828_v16, %v828_v16  ;;  %v1520_v48 = vpop.f32.mrb[10].mxu0 }
 0x1d4   :  { %v962_v49 = vadd.f32 %v961_v19, %v960_v7  ;;  %v831_v40 = vpop.f32.mrb[11].mxu0  ;;  %v946_v54 = vmul.f32 %v1520_v48, %v1520_v48  ;;  %v967_v58 = vsel %vm955_vm3, %v945_v50, 0.0 }
 0x1d5   :  { %v963_v51 = vsel %vm955_vm3, %v943_v47, 0.0  ;;  %v944_v52 = vmul.f32 %v831_v40, %v831_v40 }
 0x1d6   :  { %v964_v53 = vadd.f32 %v963_v51, %v962_v49  ;;  %v969_v62 = vsel %vm955_vm3, %v946_v54, 0.0 }
 0x1d7   :  { %v965_v55 = vsel %vm955_vm3, %v944_v52, 0.0 }
 0x1d8   :  { %v966_v57 = vadd.f32 %v965_v55, %v964_v53 }
 0x1d9   :  { %v1523_v59 = vpop.f32.mrb[12].mxu0 }
 0x1da   :  { %v968_v60 = vadd.f32 %v967_v58, %v966_v57  ;;  %v844_v61 = vpop.f32.mrb[13].mxu0  ;;  %v949_v4 = vmul.f32 %v1523_v59, %v1523_v59 }
 0x1db   :  { %v947_v63 = vmul.f32 %v844_v61, %v844_v61  ;;  %v1524_v0 = vpop.f32.mrb[14].mxu0 }
 0x1dc   :  { %v970_v1 = vadd.f32 %v969_v62, %v968_v60  ;;  %v847_v3 = vpop.f32.mrb[15].mxu0  ;;  %v950_v9 = vmul.f32 %v1524_v0, %v1524_v0  ;;  %v975_v12 = vsel %vm955_vm3, %v949_v4, 0.0 }
 0x1dd   :  { %v971_v5 = vsel %vm955_vm3, %v947_v63, 0.0  ;;  %v948_v6 = vmul.f32 %v847_v3, %v847_v3 }
 0x1de   :  { %v972_v8 = vadd.f32 %v971_v5, %v970_v1  ;;  %v977_v17 = vsel %vm955_vm3, %v950_v9, 0.0 }
 0x1df   :  { %v973_v10 = vsel %vm955_vm3, %v948_v6, 0.0 }
 0x1e0   :  { %v974_v11 = vadd.f32 %v973_v10, %v972_v8 }
 0x1e1   :  { %v1527_v13 = vpop.f32.mrb[16].mxu0 }
 0x1e2   :  { %v976_v14 = vadd.f32 %v975_v12, %v974_v11  ;;  %v860_v15 = vpop.f32.mrb[17].mxu0  ;;  %v953_v23 = vmul.f32 %v1527_v13, %v1527_v13 }
 0x1e3   :  { %v951_v18 = vmul.f32 %v860_v15, %v860_v15  ;;  %v1528_v20 = vpop.f32.mrb[18].mxu0 }
 0x1e4   :  { %v978_v21 = vadd.f32 %v977_v17, %v976_v14  ;;  %v863_v22 = vpop.f32.mrb[19].mxu0  ;;  %v954_v27 = vmul.f32 %v1528_v20, %v1528_v20  ;;  %v983_v30 = vsel %vm955_vm3, %v953_v23, 0.0 }
 0x1e5   :  { %v979_v24 = vsel %vm955_vm3, %v951_v18, 0.0  ;;  %v952_v25 = vmul.f32 %v863_v22, %v863_v22 }
 0x1e6   :  { %v980_v26 = vadd.f32 %v979_v24, %v978_v21  ;;  %v985_v38 = vsel %vm955_vm3, %v954_v27, 0.0 }
 0x1e7   :  { %v981_v28 = vsel %vm955_vm3, %v952_v25, 0.0 }
 0x1e8   :  { %v982_v29 = vadd.f32 %v981_v28, %v980_v26 }
 0x1e9   :  { %v1531_v56 = vpop.f32.mrb[20].mxu0 }
 0x1ea   :  { %v984_v32 = vadd.f32 %v983_v30, %v982_v29  ;;  %v876_v37 = vpop.f32.mrb[21].mxu0  ;;  %v1013_v34 = vmul.f32 %v1531_v56, %v1531_v56 }
 0x1eb   :  { %v1011_v39 = vmul.f32 %v876_v37, %v876_v37  ;;  %v1532_v41 = vpop.f32.mrb[22].mxu0 }
 0x1ec   :  { %v986_v42 = vadd.f32 %v985_v38, %v984_v32  ;;  %v879_v43 = vpop.f32.mrb[23].mxu0  ;;  %v1014_v33 = vmul.f32 %v1532_v41, %v1532_v41  ;;  %v1030_v19 = vsel %vm955_vm3, %v1013_v34, 0.0 }
 0x1ed   :  { %v1012_v44 = vmul.f32 %v879_v43, %v879_v43  ;;  %v1027_v46 = vsel %vm955_vm3, %v1011_v39, 0.0 }
 0x1ee   :  { %v987_v45 = vrot.slane %v986_v42, 4  ;;  %v1032_v50 = vsel %vm955_vm3, %v1014_v33, 0.0 }
 0x1ef   :  { %v1028_v2 = vsel %vm955_vm3, %v1012_v44, 0.0 }
 0x1f0   :  { %v988_v7 = vadd.f32 %v987_v45, %v986_v42  ;;  %v1029_v16 = vadd.f32 %v1028_v2, %v1027_v46 }
 0x1f1   :  { %v1535_v47 = vpop.f32.mrb[24].mxu0 }
 0x1f2   :  { %v989_v48 = vrot.slane %v988_v7, 2  ;;  %v1031_v49 = vadd.f32 %v1030_v19, %v1029_v16  ;;  %v892_v40 = vpop.f32.mrb[25].mxu0  ;;  %v1017_v57 = vmul.f32 %v1535_v47, %v1535_v47 }
 0x1f3   :  { %v1015_v51 = vmul.f32 %v892_v40, %v892_v40  ;;  %v1536_v52 = vpop.f32.mrb[26].mxu0 }
 0x1f4   :  { %v990_v53 = vadd.f32 %v989_v48, %v988_v7  ;;  %v1033_v54 = vadd.f32 %v1032_v50, %v1031_v49  ;;  %v895_v55 = vpop.f32.mrb[27].mxu0  ;;  %v1018_v62 = vmul.f32 %v1536_v52, %v1536_v52  ;;  %v1038_v3 = vsel %vm955_vm3, %v1017_v57, 0.0 }
 0x1f5   :  { %v1034_v58 = vsel %vm955_vm3, %v1015_v51, 0.0  ;;  %v1016_v59 = vmul.f32 %v895_v55, %v895_v55 }
 0x1f6   :  { %v991_v60 = vrot.slane %v990_v53, 1  ;;  %v1035_v61 = vadd.f32 %v1034_v58, %v1033_v54  ;;  %v1040_v8 = vsel %vm955_vm3, %v1018_v62, 0.0 }
 0x1f7   :  { %v1036_v63 = vsel %vm955_vm3, %v1016_v59, 0.0 }
 0x1f8   :  { %v992_v0 = vadd.f32 %v991_v60, %v990_v53  ;;  %v1037_v1 = vadd.f32 %v1036_v63, %v1035_v61  ;;  %v1110_v53 = vunpack.c.l.bf16 %v1852_v35  ;;  %v1111_v61 = vunpack.c.h.bf16 %v1852_v35 }
 0x1f9   :  { %v1539_v4 = vpop.f32.mrb[28].mxu0  ;;  %v1112_v63 = vunpack.c.l.bf16 %v1861_v36 }
 0x1fa   :  { %v1039_v5 = vadd.f32 %v1038_v3, %v1037_v1  ;;  %v908_v6 = vpop.f32.mrb[29].mxu0  ;;  %1603 = vrsqrt.f32 %v992_v0  ;;  %v1021_v13 = vmul.f32 %v1539_v4, %v1539_v4  ;;  %vm995_vm4 = vcmp.eq.f32.partialorder %v992_v0, inf }
 0x1fb   :  { %v1019_v9 = vmul.f32 %v908_v6, %v908_v6  ;;  %v1540_v10 = vpop.f32.mrb[30].mxu0  ;;  %v998_v42 = vand.u32 2147483648, %v992_v0  ;;  %vm997_vm6 = vcmp.eq.f32.partialorder %v992_v0, 0.0  ;;  %v1142_v59 = vand.u32 2147483647, %v1110_v53 }
 0x1fc   :  { %v1041_v11 = vadd.f32 %v1040_v8, %v1039_v5  ;;  %v911_v12 = vpop.f32.mrb[31].mxu0  ;;  %v1022_v18 = vmul.f32 %v1540_v10, %v1540_v10  ;;  %v1046_v22 = vsel %vm955_vm3, %v1021_v13, 0.0  ;;  %v1113_v4 = vunpack.c.h.bf16 %v1861_v36 }
 0x1fd   :  { %v1042_v14 = vsel %vm955_vm3, %v1019_v9, 0.0  ;;  %v1020_v15 = vmul.f32 %v911_v12, %v911_v12  ;;  %v1201_v1 = vsel %vm389_vm5, %v1142_v59, 0.0  ;;  %v1144_v5 = vand.u32 2147483647, %v1112_v63 }
 0x1fe   :  { %v1043_v17 = vadd.f32 %v1042_v14, %v1041_v11  ;;  %v1048_v26 = vsel %vm955_vm3, %v1022_v18, 0.0  ;;  %v1202_v3 = vadd.f32 %v1201_v1, %v1957_v31  ;;  %v1145_v9 = vand.u32 2147483647, %v1113_v4 }
 0x1ff   :  { %v1044_v20 = vsel %vm955_vm3, %v1020_v15, 0.0  ;;  %v1205_v10 = vsel %vm389_vm5, %v1144_v5, 0.0 }
 0x200   :  { %v1045_v21 = vadd.f32 %v1044_v20, %v1043_v17  ;;  %v1207_v15 = vsel %vm389_vm5, %v1145_v9, 0.0 }
 0x201   :  { %v1543_v23 = vpop.f32.mrb[32].mxu0 }
 0x202   :  { %v1047_v24 = vadd.f32 %v1046_v22, %v1045_v21  ;;  %v924_v25 = vpop.f32.mrb[33].mxu0  ;;  %v1025_v32 = vmul.f32 %v1543_v23, %v1543_v23 }
 0x203   :  { %v1023_v27 = vmul.f32 %v924_v25, %v924_v25  ;;  %v1544_v28 = vpop.f32.mrb[34].mxu0 }
 0x204   :  { %v1604_v29 = vpop.eup %1603  ;;  %v1049_v30 = vadd.f32 %v1048_v26, %v1047_v24  ;;  %v927_v56 = vpop.f32.mrb[35].mxu0  ;;  %v1026_v43 = vmul.f32 %v1544_v28, %v1544_v28  ;;  %v1054_v33 = vsel %vm955_vm3, %v1025_v32, 0.0  ;;  %v1221_v28 = vstv %s1220_s21 }
 0x205   :  { %v1050_v37 = vsel %vm955_vm3, %v1023_v27, 0.0  ;;  %v1024_v38 = vmul.f32 %v927_v56, %v927_v56  ;;  %v994_v39 = vmul.f32 %v1604_v29, %v992_v0 }
 0x206   :  { %v1051_v41 = vadd.f32 %v1050_v37, %v1049_v30  ;;  %v1056_v16 = vsel %vm955_vm3, %v1026_v43, 0.0 }
 0x207   :  { %v1052_v34 = vsel %vm955_vm3, %v1024_v38, 0.0  ;;  %v996_v44 = vsel %vm995_vm4, %v992_v0, %v994_v39  ;;  %v1143_v0 = vand.u32 2147483647, %v1111_v61 }
 0x208   :  { %v1053_v45 = vadd.f32 %v1052_v34, %v1051_v41  ;;  %v999_v46 = vsel %vm997_vm6, %v998_v42, %v996_v44 }
 0x209   :  { %v1000_v2 = vsel %vm264_vm2, %v999_v46, 0.0  ;;  %v1203_v6 = vsel %vm389_vm5, %v1143_v0, 0.0 }
 0x20a   :  { %v1055_v7 = vadd.f32 %v1054_v33, %v1053_v45  ;;  %1001 = vadd.xlane.f32.xlu1 %v1000_v2  ;;  %v1204_v8 = vadd.f32 %v1203_v6, %v1202_v3 }
 0x20c   :  { %v1057_v19 = vadd.f32 %v1056_v16, %v1055_v7  ;;  %v267_v47 = vpop.xlane.xlu0 %266  ;;  %v1206_v13 = vadd.f32 %v1205_v10, %v1204_v8 }
 0x20d   :  { %v268_v48 = vrot.slane %v267_v47, 4 }
 0x20e   :  { %v1058_v49 = vrot.slane %v1057_v19, 4  ;;  %v1208_v36 = vadd.f32 %v1207_v15, %v1206_v13 }
 0x20f   :  { %v269_v40 = vadd.f32 %v268_v48, %v267_v47 }
 0x210   :  { %v1059_v50 = vadd.f32 %v1058_v49, %v1057_v19 }
 0x211   :  { %v270_v51 = vrot.slane %v269_v40, 2 }
 0x212   :  { %v1060_v52 = vrot.slane %v1059_v50, 2 }
 0x213   :  { %v271_v54 = vadd.f32 %v270_v51, %v269_v40 }
 0x214   :  { %v1061_v55 = vadd.f32 %v1060_v52, %v1059_v50 }
 0x215   :  { %v272_v57 = vrot.slane %v271_v54, 1 }
 0x216   :  { %v1062_v58 = vrot.slane %v1061_v55, 1 }
 0x217   :  { %v273_v60 = vadd.f32 %v272_v57, %v271_v54 }
 0x218   :  { %v1063_v62 = vadd.f32 %v1062_v58, %v1061_v55 }
 0x219   :  { %1549 = vpush %v273_v60 }
 0x21a   :  { %1605 = vrsqrt.f32 %v1063_v62  ;;  %vm1066_vm7 = vcmp.eq.f32.partialorder %v1063_v62, inf  ;;  %v1069_v12 = vand.u32 2147483648, %v1063_v62  ;;  %vm1068_vm8 = vcmp.eq.f32.partialorder %v1063_v62, 0.0 }
 0x21b   :  { %1607 = vrcp.f32 %v1221_v28 }
 0x224   :  { %v1606_v35 = vpop.eup %1605 }
 0x225   :  { %v1065_v11 = vmul.f32 %v1606_v35, %v1063_v62  ;;  %v1608_v44 = vpop.eup %1607 }
 0x227   :  { %v1067_v14 = vsel %vm1066_vm7, %v1063_v62, %v1065_v11 }
 0x228   :  { %v1070_v17 = vsel %vm1068_vm8, %v1069_v12, %v1067_v14 }
 0x229   :  { %v1071_v31 = vsel %vm264_vm2, %v1070_v17, 0.0 }
 0x22a   :  { %1072 = vadd.xlane.f32.xlu1 %v1071_v31 }
 0x22e   :  { %1209 = vadd.xlane.f32.xlu1 %v1208_v36 }
 0x24a   :  { %s2002_s3 = spop %1549 }
 0x24b   :  { %1231 = sst [smem:[#allocation7]] %s2002_s3 }
 0x297   :  { %v1002_v18 = vpop.xlane.xlu1 %1001 }
 0x298   :  { %v1003_v20 = vrot.slane %v1002_v18, 4 }
 0x29a   :  { %v1004_v21 = vadd.f32 %v1003_v20, %v1002_v18 }
 0x29c   :  { %v1005_v22 = vrot.slane %v1004_v21, 2 }
 0x29e   :  { %v1006_v23 = vadd.f32 %v1005_v22, %v1004_v21 }
 0x2a0   :  { %v1007_v24 = vrot.slane %v1006_v23, 1 }
 0x2a2   :  { %v1008_v25 = vadd.f32 %v1007_v24, %v1006_v23 }
 0x2a4   :  { %1551 = vpush %v1008_v25 }
 0x2b7   :  { %v1073_v26 = vpop.xlane.xlu1 %1072 }
 0x2b8   :  { %v1074_v27 = vrot.slane %v1073_v26, 4 }
 0x2ba   :  { %v1075_v29 = vadd.f32 %v1074_v27, %v1073_v26 }
 0x2bb   :  { %v1210_v30 = vpop.xlane.xlu1 %1209 }
 0x2bc   :  { %v1076_v56 = vrot.slane %v1075_v29, 2  ;;  %v1211_v32 = vrot.slane %v1210_v30, 4 }
 0x2be   :  { %v1212_v37 = vadd.f32 %v1211_v32, %v1210_v30  ;;  %v1077_v38 = vadd.f32 %v1076_v56, %v1075_v29 }
 0x2c0   :  { %v1213_v39 = vrot.slane %v1212_v37, 2  ;;  %v1078_v41 = vrot.slane %v1077_v38, 1 }
 0x2c2   :  { %v1214_v42 = vadd.f32 %v1213_v39, %v1212_v37  ;;  %v1079_v43 = vadd.f32 %v1078_v41, %v1077_v38 }
 0x2c4   :  { %1553 = vpush %v1079_v43  ;;  %v1215_v34 = vrot.slane %v1214_v42, 1 }
 0x2c6   :  { %v1216_v45 = vadd.f32 %v1215_v34, %v1214_v42 }
 0x2c8   :  { %1555 = vpush %v1216_v45 }
 0x2c9   :  { %1557 = vpush %v1608_v44 }
 0x2d5   :  { %s1552_s0 = spop %1551 }
 0x2f5   :  { %s1554_s22 = spop %1553 }
 0x2f6   :  { %s1081_s24 = sadd.f32 %s1554_s22, %s1552_s0 }
 0x2f9   :  { %s1556_s23 = spop %1555 }
 0x2fa   :  { %s1218_s25 = smul.f32 0.01, %s1556_s23  ;;  %s1558_s5 = spop %1557 }
 0x2fb   :  { %s1224_s27 = smul.f32 %s1558_s5, %s2002_s3 }
 0x2fc   :  { %s1219_s26 = sadd.f32 %s1218_s25, %s1081_s24 }
 0x2fe   :  { %1229 = sst [smem:[#allocation5]] %s1219_s26 }
 0x2ff   :  { %1618 = shalt.err (!%p1615_p2)
}
 0x300   :  { %s1648_s12 = smov [#allocation5]   ;;  %s1225_s15 = sadd.f32 %s1224_s27, %s1219_s26 }
 0x301   :  { %1247 = dma.smem_to_hbm %s1648_s12, 16, %s2055_s9, [#allocation6]  }
 0x302   :  { %s1619_s17 = scalar_lea.hbm %s2056_s10, 16 }
 0x303   :  { %p1620_p3 = scmp.ne.s32.totalorder %s2056_s10, %s1619_s17  ;;  %p1623_p4 = scmp.lt.u32.totalorder %s1619_s17, %s2056_s10 }
 0x305   :  { %p1625_p5 = pnand %p1623_p4, %p1620_p3 }
 0x307   :  { %1628 = shalt.err (!%p1625_p5)
}
 0x308   :  { %s1649_s20 = smov [#allocation7]   ;;  %1227 = sst [smem:[#allocation3]] %s1225_s15 }
 0x309   :  { %1255 = dma.smem_to_hbm %s1649_s20, 16, %s2056_s10, [#allocation6]  }
 0x30a   :  { %s1629_s23 = scalar_lea.hbm %s2054_s8, 16 }
 0x30b   :  { %p1630_p6 = scmp.ne.s32.totalorder %s2054_s8, %s1629_s23  ;;  %p1633_p7 = scmp.lt.u32.totalorder %s1629_s23, %s2054_s8 }
 0x30d   :  { %p1635_p8 = pnand %p1633_p7, %p1630_p6 }
 0x30f   :  { %1638 = shalt.err (!%p1635_p8)
}
 0x310   :  { %s1650_s27 = smov [#allocation3]  }
 0x311   :  { %1239 = dma.smem_to_hbm %s1650_s27, 16, %s2054_s8, [#allocation4]  }
 0x312   :  { %1639 = dma.done.wait [#allocation4], 16  }
 0x313   :  { %1640 = vsyncadd [#allocation4], 4294967280 }
 0x314   :  { %1641 = dma.done.wait [#allocation6], 32  }
 0x315   :  { %1642 = vsyncadd [#allocation6], 4294967264 }
 0x316   :  { %1265 = sfence }
 0x317   :  { %1266 = vsyncpa [#allocation4], 1 }
 0x318   :  { %1267 = vsyncpa [#allocation6], 1 }

</bundles_post_ra>
